<compile_context>
chip_gen: v5e
topology: v5e:2x2
jax: 0.10.0
libtpu: 0.0.40
codegen_flags: <defaults>
</compile_context>

<pallas_src>
import functools

import jax
import jax.numpy as jnp
from jax.experimental import pallas as pl
from jax.experimental.pallas import tpu as pltpu


def _round_up(x, m):
    return ((x + m - 1) // m) * m


def _vmem_limit_bytes():
    """~100 MiB on v5e/v6e (128 MiB physical), ~56 MiB on v7x (64 MiB/TC)."""
    try:
        cap = int(pltpu.get_tpu_info().vmem_capacity_bytes)
    except Exception:
        cap = 128 * 1024 * 1024
    return max(32 * 1024 * 1024, min(cap - 8 * 1024 * 1024, 100 * 1024 * 1024))


def lstm_chunk_kernel(x_ref, h0_ref, c0_ref, wx_ref, wh_ref, b_ref,
                      h_out_ref, c_out_ref, h_scr, hb_scr, c_scr,
                      *, t_chunk, seq_len):
    """Processes one chunk of t_chunk timesteps for one batch block.

    Shapes (padded / blocked):
      x_ref  : [Tc*Bb, Ip]  bf16 input slab for this chunk (rows = (t, b))
      h0_ref : [Bb, Hp]     fp32 initial hidden state
      c0_ref : [Bb, Hp]     fp32 initial cell state
      wx_ref : [Ip, 4*Hp]   bf16 input->gate weights (gate order f, i, o, C)
      wh_ref : [Hp, 4*Hp]   bf16 hidden->gate weights
      b_ref  : [1, 4*Hp]    fp32 gate biases
      h_out_ref / c_out_ref : [Bb, Hp] fp32 final states
      h_scr / hb_scr / c_scr: carries resident across the time-chunk axis
    """
    tc_idx = pl.program_id(1)
    Bb, Hp = h_scr.shape

    # Initialize the carries once per batch block.
    @pl.when(tc_idx == 0)
    def _():
        h0 = h0_ref[...]
        h_scr[...] = h0
        hb_scr[...] = h0.astype(jnp.bfloat16)
        c_scr[...] = c0_ref[...]

    # Hoisted input projection: one big MXU matmul per chunk (off the serial
    # h-dependency path); the bias broadcast also happens once per chunk.
    gates_x = jnp.dot(x_ref[...], wx_ref[...],
                      preferred_element_type=jnp.float32) + b_ref[...]

    needs_mask = (seq_len % t_chunk) != 0

    # Fully unrolled per-step loop (t_chunk is a small static int).
    for step in range(t_chunk):
        c_prev = c_scr[...]
        gates = gates_x[step * Bb:(step + 1) * Bb, :] + jnp.dot(
            hb_scr[...], wh_ref[...], preferred_element_type=jnp.float32)

        # sigmoid(z) = 0.5*tanh(0.5*z) + 0.5 -> single EUP push per gate;
        # the extra mul/add rides otherwise-free VALU slots.
        f = 0.5 * jnp.tanh(0.5 * gates[:, 0 * Hp:1 * Hp]) + 0.5
        i = 0.5 * jnp.tanh(0.5 * gates[:, 1 * Hp:2 * Hp]) + 0.5
        o = 0.5 * jnp.tanh(0.5 * gates[:, 2 * Hp:3 * Hp]) + 0.5
        C = jnp.tanh(gates[:, 3 * Hp:4 * Hp])

        # Elementwise tail stays fp32 (portable: v5e has no bf16 VPU/EUP).
        # TODO(synk): on v6e/v7x a bf16 gate-nonlinearity path (~2x EUP) and a
        # fused K=256 matmul for small Ip/Hp would help; needs chip gating.
        c_new = f * c_prev + i * C
        h_new = o * jnp.tanh(c_new)

        if needs_mask:
            # Zero-padded timesteps (t >= seq_len) must not advance the state.
            valid = (tc_idx * t_chunk + step) < seq_len
            h_new = jnp.where(valid, h_new, h_scr[...])
            c_new = jnp.where(valid, c_new, c_prev)

        h_scr[...] = h_new
        hb_scr[...] = h_new.astype(jnp.bfloat16)   # cast off the serial path
        c_scr[...] = c_new

    # Write the outputs only on the last time chunk of this batch block.
    @pl.when(tc_idx == pl.num_programs(1) - 1)
    def _():
        h_out_ref[...] = h_scr[...]
        c_out_ref[...] = c_scr[...]


def init_params(key, input_size, hidden_size):
    """Per-gate params mimicking nn.Linear uniform(-1/sqrt(fan_in), ...)."""
    fan_in = input_size + hidden_size
    bound = 1.0 / float(fan_in) ** 0.5
    keys = jax.random.split(key, 8)
    ws = [jax.random.uniform(keys[g], (fan_in, hidden_size), jnp.float32,
                             -bound, bound) for g in range(4)]     # f, i, o, C
    bs = [jax.random.uniform(keys[4 + g], (hidden_size,), jnp.float32,
                             -bound, bound) for g in range(4)]
    return ws, bs


def pack_params(ws, bs, input_size, hidden_size, matmul_dtype=jnp.bfloat16):
    """Pack the 4 per-gate Linear params into padded kernel operands."""
    I, H = input_size, hidden_size
    Ip = _round_up(I, 128)
    Hp = _round_up(H, 128)
    wx = jnp.zeros((Ip, 4 * Hp), jnp.float32)
    wh = jnp.zeros((Hp, 4 * Hp), jnp.float32)
    b = jnp.zeros((1, 4 * Hp), jnp.float32)
    for g in range(4):
        wx = wx.at[:I, g * Hp:g * Hp + H].set(ws[g][:I, :])
        wh = wh.at[:H, g * Hp:g * Hp + H].set(ws[g][I:, :])
        b = b.at[0, g * Hp:g * Hp + H].set(bs[g])
    # Zero padding keeps padded h/c columns identically zero across steps.
    return wx.astype(matmul_dtype), wh.astype(matmul_dtype), b


def lstm_loop(x_seq, h0, c0, wx, wh, b, hidden_size, *, t_chunk=8):
    """LSTM_module.loop: full sequence in ONE pallas_call.

    x_seq: [B, T, I], h0/c0: [B, H].  Returns final (h, c), each [B, H].
    """
    B, T, I = x_seq.shape
    H = hidden_size
    Ip, four_hp = wx.shape
    Hp = wh.shape[0]
    assert four_hp == 4 * Hp and wh.shape[1] == 4 * Hp

    Tc = max(1, min(int(t_chunk), T))
    Tn = -(-T // Tc)
    Tpad = Tn * Tc

    # Batch blocking: pad to a multiple of 16 (bf16 sublane tile) and, when
    # B > 16, split into >= 2 blocks so the "parallel" batch axis can be
    # sharded across v7x's two TensorCores.
    Bp = _round_up(B, 16)
    if B > 16 and Bp <= 256:
        Bp = _round_up(B, 32)
        b_block = Bp // 2
    elif Bp > 256:
        b_block = 128
        Bp = _round_up(B, 128)
    else:
        b_block = Bp
    nb = Bp // b_block

    # Host-side bf16 input layout [nb, Tn, Tc, b_block, Ip] flattened to 2D so
    # every grid step reads ONE contiguous lane-aligned (Tc*b_block, Ip) slab.
    x_tbi = jnp.transpose(x_seq, (1, 0, 2)).astype(jnp.bfloat16)        # [T,B,I]
    x_full = jnp.zeros((Tpad, Bp, Ip), jnp.bfloat16).at[:T, :B, :I].set(x_tbi)
    x2d = (x_full.reshape(Tn, Tc, nb, b_block, Ip)
                 .transpose(2, 0, 1, 3, 4)
                 .reshape(nb * Tpad * b_block, Ip))

    h0_pad = jnp.zeros((Bp, Hp), jnp.float32).at[:B, :H].set(h0.astype(jnp.float32))
    c0_pad = jnp.zeros((Bp, Hp), jnp.float32).at[:B, :H].set(c0.astype(jnp.float32))

    flops = (2 * Tpad * Bp * Ip * 4 * Hp          # hoisted x projection
             + 2 * Tpad * Bp * Hp * 4 * Hp        # recurrent matmul
             + 12 * Tpad * Bp * Hp)               # elementwise tail
    transcendentals = 5 * Tpad * Bp * Hp
    bytes_accessed = (int(x2d.size) * 2 + int(wx.size) * 2 + int(wh.size) * 2
                      + int(b.size) * 4 + 6 * Bp * Hp * 4)

    kernel = functools.partial(lstm_chunk_kernel, t_chunk=Tc, seq_len=T)

    # NOTE: Wx/Wh stay fully VMEM-resident (single copy).  For very large H
    # (2*(Ip+Hp)*4*Hp bf16 bytes approaching ~48 MiB on v7x's 64 MiB/TC), add
    # a grid axis tiling the 4H gate-column dimension, or quantize the weights
    # (int8 on v5e/v6e, fp8 on v7x).
    h_out, c_out = pl.pallas_call(
        kernel,
        out_shape=(jax.ShapeDtypeStruct((Bp, Hp), jnp.float32),
                   jax.ShapeDtypeStruct((Bp, Hp), jnp.float32)),
        grid_spec=pltpu.PrefetchScalarGridSpec(
            num_scalar_prefetch=0,
            grid=(nb, Tn),
            in_specs=[
                # Streaming bf16 x chunk: (Tc*b_block, Ip) per grid step.
                pl.BlockSpec((Tc * b_block, Ip),
                             lambda bi, tc: (bi * Tn + tc, 0)),
                pl.BlockSpec((b_block, Hp), lambda bi, tc: (bi, 0)),
                pl.BlockSpec((b_block, Hp), lambda bi, tc: (bi, 0)),
                # Weights/bias: whole-array VMEM residents, single-buffered.
                pl.BlockSpec(memory_space=pltpu.MemorySpace.VMEM),
                pl.BlockSpec(memory_space=pltpu.MemorySpace.VMEM),
                pl.BlockSpec(memory_space=pltpu.MemorySpace.VMEM),
            ],
            out_specs=(
                pl.BlockSpec((b_block, Hp), lambda bi, tc: (bi, 0)),
                pl.BlockSpec((b_block, Hp), lambda bi, tc: (bi, 0)),
            ),
            scratch_shapes=[
                pltpu.VMEM((b_block, Hp), jnp.float32),    # h carry (fp32)
                pltpu.VMEM((b_block, Hp), jnp.bfloat16),   # h carry (bf16, MXU input)
                pltpu.VMEM((b_block, Hp), jnp.float32),    # c carry (fp32)
            ],
        ),
        compiler_params=pltpu.CompilerParams(
            dimension_semantics=("parallel", "arbitrary"),
            vmem_limit_bytes=_vmem_limit_bytes()),
        cost_estimate=pl.CostEstimate(
            flops=int(flops),
            transcendentals=int(transcendentals),
            bytes_accessed=int(bytes_accessed)),
    )(x2d, h0_pad, c0_pad, wx, wh, b)

    return h_out[:B, :H], c_out[:B, :H]


def lstm_step(x, h, c, wx, wh, b, hidden_size):
    """LSTM_module.forward: a single step == a T=1 sequence."""
    return lstm_loop(x[:, None, :], h, c, wx, wh, b, hidden_size, t_chunk=1)


# ------------------------- pure-JAX fp32 reference -------------------------

def reference_step(x, h, c, ws, bs):
    combined = jnp.concatenate([x, h], axis=1)
    f = jax.nn.sigmoid(combined @ ws[0] + bs[0])
    i = jax.nn.sigmoid(combined @ ws[1] + bs[1])
    o = jax.nn.sigmoid(combined @ ws[2] + bs[2])
    C = jnp.tanh(combined @ ws[3] + bs[3])
    c_new = f * c + i * C
    h_new = o * jnp.tanh(c_new)
    return h_new, c_new


def reference_loop(x_seq, h0, c0, ws, bs):
    h, c = h0, c0
    for t in range(x_seq.shape[1]):
        h, c = reference_step(x_seq[:, t, :], h, c, ws, bs)
    return h, c


if __name__ == "__main__":
    input_size = 16
    hidden_size = 32

    key = jax.random.PRNGKey(0)
    k_param, k_x, k_seq1, k_seq2 = jax.random.split(key, 4)

    ws, bs = init_params(k_param, input_size, hidden_size)
    wx, wh, b = pack_params(ws, bs, input_size, hidden_size)

    # --- single forward step (LSTM_module.forward) ---
    batch = 8
    x = jax.random.normal(k_x, (batch, input_size), jnp.float32)
    h0 = jnp.zeros((batch, hidden_size), jnp.float32)
    c0 = jnp.zeros((batch, hidden_size), jnp.float32)
    h1, c1 = lstm_step(x, h0, c0, wx, wh, b, hidden_size)
    jax.block_until_ready((h1, c1))
    h_ref, c_ref = reference_step(x, h0, c0, ws, bs)
    assert jnp.allclose(h1, h_ref, atol=2e-2, rtol=2e-2), "hidden mismatch (step)"
    assert jnp.allclose(c1, c_ref, atol=2e-2, rtol=2e-2), "cell mismatch (step)"

    # --- sequence (LSTM_module.loop): whole sequence fits one time chunk ---
    seq_len = 8
    seq = jax.random.normal(k_seq1, (batch, seq_len, input_size), jnp.float32)
    h_T, c_T = lstm_loop(seq, h0, c0, wx, wh, b, hidden_size)
    jax.block_until_ready((h_T, c_T))
    h_ref_T, c_ref_T = reference_loop(seq, h0, c0, ws, bs)
    assert jnp.allclose(h_T, h_ref_T, atol=5e-2, rtol=5e-2), "hidden mismatch (loop)"
    assert jnp.allclose(c_T, c_ref_T, atol=5e-2, rtol=5e-2), "cell mismatch (loop)"

    # --- multi-chunk + ragged time tail + two batch blocks (megacore path) ---
    batch2, seq_len2 = 20, 6
    seq2 = jax.random.normal(k_seq2, (batch2, seq_len2, input_size), jnp.float32)
    h02 = jnp.zeros((batch2, hidden_size), jnp.float32)
    c02 = jnp.zeros((batch2, hidden_size), jnp.float32)
    h_T2, c_T2 = lstm_loop(seq2, h02, c02, wx, wh, b, hidden_size, t_chunk=4)
    jax.block_until_ready((h_T2, c_T2))
    h_ref2, c_ref2 = reference_loop(seq2, h02, c02, ws, bs)
    assert jnp.allclose(h_T2, h_ref2, atol=5e-2, rtol=5e-2), "hidden mismatch (loop2)"
    assert jnp.allclose(c_T2, c_ref2, atol=5e-2, rtol=5e-2), "cell mismatch (loop2)"

    print("KERNEL_OK")
</pallas_src>

<mosaic_0001>
module attributes {stable_mosaic.version = 11 : i64} {
  func.func @lstm_chunk_kernel(%arg0: i32, %arg1: i32, %arg2: memref<16x128xbf16, #tpu.memory_space<vmem>>, %arg3: memref<16x128xf32, #tpu.memory_space<vmem>>, %arg4: memref<16x128xf32, #tpu.memory_space<vmem>>, %arg5: memref<128x512xbf16, #tpu.memory_space<vmem>>, %arg6: memref<128x512xbf16, #tpu.memory_space<vmem>>, %arg7: memref<1x512xf32, #tpu.memory_space<vmem>>, %arg8: memref<16x128xf32, #tpu.memory_space<vmem>>, %arg9: memref<16x128xf32, #tpu.memory_space<vmem>>, %arg10: memref<16x128xf32, #tpu.memory_space<vmem>>, %arg11: memref<16x128xbf16, #tpu.memory_space<vmem>>, %arg12: memref<16x128xf32, #tpu.memory_space<vmem>>) attributes {dimension_semantics = [#tpu.dimension_semantics<parallel>, #tpu.dimension_semantics<arbitrary>], iteration_bounds = array<i64: 1, 1>, scalar_prefetch = 0 : i64, scratch_operands = 3 : i64, tpu.core_type = #tpu.core_type<tc>, window_params = [{transform_indices = @transform_0, window_bounds = array<i64: 16, 128>}, {transform_indices = @transform_1, window_bounds = array<i64: 16, 128>}, {transform_indices = @transform_2, window_bounds = array<i64: 16, 128>}, {pipeline_mode = #tpu.pipeline_mode<synchronous>, transform_indices = @transform_3, window_bounds = array<i64: 128, 512>}, {pipeline_mode = #tpu.pipeline_mode<synchronous>, transform_indices = @transform_4, window_bounds = array<i64: 128, 512>}, {pipeline_mode = #tpu.pipeline_mode<synchronous>, transform_indices = @transform_5, window_bounds = array<i64: 1, 512>}, {transform_indices = @transform_6, window_bounds = array<i64: 16, 128>}, {transform_indices = @transform_7, window_bounds = array<i64: 16, 128>}]} {
    %c0_i32 = arith.constant 0 : i32
    %0 = arith.cmpi eq, %arg1, %c0_i32 : i32
    %1 = arith.extui %0 : i1 to i32
    %c0_i32_0 = arith.constant 0 : i32
    %2 = arith.cmpi ne, %1, %c0_i32_0 : i32
    scf.if %2 {
      %c0_30 = arith.constant 0 : index
      %c0_31 = arith.constant 0 : index
      %52 = vector.load %arg3[%c0_30, %c0_31] : memref<16x128xf32, #tpu.memory_space<vmem>>, vector<16x128xf32>
      %c0_32 = arith.constant 0 : index
      %c0_33 = arith.constant 0 : index
      %53 = vector.load %arg10[%c0_32, %c0_33] : memref<16x128xf32, #tpu.memory_space<vmem>>, vector<16x128xf32>
      tpu.vector_store %arg10[%c0_32, %c0_33], %52 {strides = array<i32>} : memref<16x128xf32, #tpu.memory_space<vmem>>, vector<16x128xf32>,
      %54 = arith.truncf %52 : vector<16x128xf32> to vector<16x128xbf16>
      %c0_34 = arith.constant 0 : index
      %c0_35 = arith.constant 0 : index
      %55 = vector.load %arg11[%c0_34, %c0_35] : memref<16x128xbf16, #tpu.memory_space<vmem>>, vector<16x128xbf16>
      tpu.vector_store %arg11[%c0_34, %c0_35], %54 {strides = array<i32>} : memref<16x128xbf16, #tpu.memory_space<vmem>>, vector<16x128xbf16>,
      %c0_36 = arith.constant 0 : index
      %c0_37 = arith.constant 0 : index
      %56 = vector.load %arg4[%c0_36, %c0_37] : memref<16x128xf32, #tpu.memory_space<vmem>>, vector<16x128xf32>
      %c0_38 = arith.constant 0 : index
      %c0_39 = arith.constant 0 : index
      %57 = vector.load %arg12[%c0_38, %c0_39] : memref<16x128xf32, #tpu.memory_space<vmem>>, vector<16x128xf32>
      tpu.vector_store %arg12[%c0_38, %c0_39], %56 {strides = array<i32>} : memref<16x128xf32, #tpu.memory_space<vmem>>, vector<16x128xf32>,
    } else {
    }
    %c0 = arith.constant 0 : index
    %c0_1 = arith.constant 0 : index
    %3 = vector.load %arg2[%c0, %c0_1] : memref<16x128xbf16, #tpu.memory_space<vmem>>, vector<16x128xbf16>
    %c0_2 = arith.constant 0 : index
    %c0_3 = arith.constant 0 : index
    %4 = vector.load %arg5[%c0_2, %c0_3] : memref<128x512xbf16, #tpu.memory_space<vmem>>, vector<128x512xbf16>
    %cst = arith.constant dense<0.000000e+00> : vector<16x512xf32>
    %5 = tpu.matmul %3, %4, %cst {dimension_numbers = #tpu.dot_dimension_numbers<[1], [0], [0], [1], [0, 0, 1, 1], [], []>} : vector<16x128xbf16>, vector<128x512xbf16>, vector<16x512xf32> -> vector<16x512xf32>
    %c0_4 = arith.constant 0 : index
    %c0_5 = arith.constant 0 : index
    %6 = vector.load %arg7[%c0_4, %c0_5] : memref<1x512xf32, #tpu.memory_space<vmem>>, vector<1x512xf32>
    %7 = vector.broadcast %6 : vector<1x512xf32> to vector<16x512xf32>
    %8 = arith.addf %5, %7 : vector<16x512xf32>
    %c0_6 = arith.constant 0 : index
    %c0_7 = arith.constant 0 : index
    %9 = vector.load %arg12[%c0_6, %c0_7] : memref<16x128xf32, #tpu.memory_space<vmem>>, vector<16x128xf32>
    %c0_8 = arith.constant 0 : index
    %c0_9 = arith.constant 0 : index
    %10 = vector.load %arg11[%c0_8, %c0_9] : memref<16x128xbf16, #tpu.memory_space<vmem>>, vector<16x128xbf16>
    %c0_10 = arith.constant 0 : index
    %c0_11 = arith.constant 0 : index
    %11 = vector.load %arg6[%c0_10, %c0_11] : memref<128x512xbf16, #tpu.memory_space<vmem>>, vector<128x512xbf16>
    %cst_12 = arith.constant dense<0.000000e+00> : vector<16x512xf32>
    %12 = tpu.matmul %10, %11, %cst_12 {dimension_numbers = #tpu.dot_dimension_numbers<[1], [0], [0], [1], [0, 0, 1, 1], [], []>} : vector<16x128xbf16>, vector<128x512xbf16>, vector<16x512xf32> -> vector<16x512xf32>
    %13 = arith.addf %8, %12 : vector<16x512xf32>
    %14 = vector.extract_strided_slice %13 {offsets = [0, 0], sizes = [16, 128], strides = [1, 1]} : vector<16x512xf32> to vector<16x128xf32>
    %cst_13 = arith.constant 5.000000e-01 : f32
    %15 = vector.broadcast %cst_13 : f32 to vector<16x128xf32>
    %16 = arith.mulf %15, %14 : vector<16x128xf32>
    %17 = math.tanh %16 : vector<16x128xf32>
    %cst_14 = arith.constant 5.000000e-01 : f32
    %18 = vector.broadcast %cst_14 : f32 to vector<16x128xf32>
    %19 = arith.mulf %18, %17 : vector<16x128xf32>
    %cst_15 = arith.constant 5.000000e-01 : f32
    %20 = vector.broadcast %cst_15 : f32 to vector<16x128xf32>
    %21 = arith.addf %19, %20 : vector<16x128xf32>
    %22 = vector.extract_strided_slice %13 {offsets = [0, 128], sizes = [16, 128], strides = [1, 1]} : vector<16x512xf32> to vector<16x128xf32>
    %cst_16 = arith.constant 5.000000e-01 : f32
    %23 = vector.broadcast %cst_16 : f32 to vector<16x128xf32>
    %24 = arith.mulf %23, %22 : vector<16x128xf32>
    %25 = math.tanh %24 : vector<16x128xf32>
    %cst_17 = arith.constant 5.000000e-01 : f32
    %26 = vector.broadcast %cst_17 : f32 to vector<16x128xf32>
    %27 = arith.mulf %26, %25 : vector<16x128xf32>
    %cst_18 = arith.constant 5.000000e-01 : f32
    %28 = vector.broadcast %cst_18 : f32 to vector<16x128xf32>
    %29 = arith.addf %27, %28 : vector<16x128xf32>
    %30 = vector.extract_strided_slice %13 {offsets = [0, 256], sizes = [16, 128], strides = [1, 1]} : vector<16x512xf32> to vector<16x128xf32>
    %cst_19 = arith.constant 5.000000e-01 : f32
    %31 = vector.broadcast %cst_19 : f32 to vector<16x128xf32>
    %32 = arith.mulf %31, %30 : vector<16x128xf32>
    %33 = math.tanh %32 : vector<16x128xf32>
    %cst_20 = arith.constant 5.000000e-01 : f32
    %34 = vector.broadcast %cst_20 : f32 to vector<16x128xf32>
    %35 = arith.mulf %34, %33 : vector<16x128xf32>
    %cst_21 = arith.constant 5.000000e-01 : f32
    %36 = vector.broadcast %cst_21 : f32 to vector<16x128xf32>
    %37 = arith.addf %35, %36 : vector<16x128xf32>
    %38 = vector.extract_strided_slice %13 {offsets = [0, 384], sizes = [16, 128], strides = [1, 1]} : vector<16x512xf32> to vector<16x128xf32>
    %39 = math.tanh %38 : vector<16x128xf32>
    %40 = arith.mulf %21, %9 : vector<16x128xf32>
    %41 = arith.mulf %29, %39 : vector<16x128xf32>
    %42 = arith.addf %40, %41 : vector<16x128xf32>
    %43 = math.tanh %42 : vector<16x128xf32>
    %44 = arith.mulf %37, %43 : vector<16x128xf32>
    %c0_22 = arith.constant 0 : index
    %c0_23 = arith.constant 0 : index
    %45 = vector.load %arg10[%c0_22, %c0_23] : memref<16x128xf32, #tpu.memory_space<vmem>>, vector<16x128xf32>
    tpu.vector_store %arg10[%c0_22, %c0_23], %44 {strides = array<i32>} : memref<16x128xf32, #tpu.memory_space<vmem>>, vector<16x128xf32>,
    %46 = arith.truncf %44 : vector<16x128xf32> to vector<16x128xbf16>
    %c0_24 = arith.constant 0 : index
    %c0_25 = arith.constant 0 : index
    %47 = vector.load %arg11[%c0_24, %c0_25] : memref<16x128xbf16, #tpu.memory_space<vmem>>, vector<16x128xbf16>
    tpu.vector_store %arg11[%c0_24, %c0_25], %46 {strides = array<i32>} : memref<16x128xbf16, #tpu.memory_space<vmem>>, vector<16x128xbf16>,
    %c0_26 = arith.constant 0 : index
    %c0_27 = arith.constant 0 : index
    %48 = vector.load %arg12[%c0_26, %c0_27] : memref<16x128xf32, #tpu.memory_space<vmem>>, vector<16x128xf32>
    tpu.vector_store %arg12[%c0_26, %c0_27], %42 {strides = array<i32>} : memref<16x128xf32, #tpu.memory_space<vmem>>, vector<16x128xf32>,
    %c0_i32_28 = arith.constant 0 : i32
    %49 = arith.cmpi eq, %arg1, %c0_i32_28 : i32
    %50 = arith.extui %49 : i1 to i32
    %c0_i32_29 = arith.constant 0 : i32
    %51 = arith.cmpi ne, %50, %c0_i32_29 : i32
    scf.if %51 {
      %c0_30 = arith.constant 0 : index
      %c0_31 = arith.constant 0 : index
      %52 = vector.load %arg10[%c0_30, %c0_31] : memref<16x128xf32, #tpu.memory_space<vmem>>, vector<16x128xf32>
      %c0_32 = arith.constant 0 : index
      %c0_33 = arith.constant 0 : index
      %53 = vector.load %arg8[%c0_32, %c0_33] : memref<16x128xf32, #tpu.memory_space<vmem>>, vector<16x128xf32>
      tpu.vector_store %arg8[%c0_32, %c0_33], %52 {strides = array<i32>} : memref<16x128xf32, #tpu.memory_space<vmem>>, vector<16x128xf32>,
      %c0_34 = arith.constant 0 : index
      %c0_35 = arith.constant 0 : index
      %54 = vector.load %arg12[%c0_34, %c0_35] : memref<16x128xf32, #tpu.memory_space<vmem>>, vector<16x128xf32>
      %c0_36 = arith.constant 0 : index
      %c0_37 = arith.constant 0 : index
      %55 = vector.load %arg9[%c0_36, %c0_37] : memref<16x128xf32, #tpu.memory_space<vmem>>, vector<16x128xf32>
      tpu.vector_store %arg9[%c0_36, %c0_37], %54 {strides = array<i32>} : memref<16x128xf32, #tpu.memory_space<vmem>>, vector<16x128xf32>,
    } else {
    }
    return
  }
  func.func @transform_0(%arg0: i32, %arg1: i32) -> (i32, i32) {
    %c1_i32 = arith.constant 1 : i32
    %0 = arith.muli %arg0, %c1_i32 : i32
    %1 = arith.addi %0, %arg1 : i32
    %c0_i32 = arith.constant 0 : i32
    %c0_i32_0 = arith.constant 0 : i32
    return %1, %c0_i32 : i32, i32
  }
  func.func @transform_1(%arg0: i32, %arg1: i32) -> (i32, i32) {
    %c0_i32 = arith.constant 0 : i32
    %c0_i32_0 = arith.constant 0 : i32
    return %arg0, %c0_i32 : i32, i32
  }
  func.func @transform_2(%arg0: i32, %arg1: i32) -> (i32, i32) {
    %c0_i32 = arith.constant 0 : i32
    %c0_i32_0 = arith.constant 0 : i32
    return %arg0, %c0_i32 : i32, i32
  }
  func.func @transform_3(%arg0: i32, %arg1: i32) -> (i32, i32) {
    %c0_i32 = arith.constant 0 : i32
    %c0_i32_0 = arith.constant 0 : i32
    %c0_i32_1 = arith.constant 0 : i32
    return %c0_i32, %c0_i32_0 : i32, i32
  }
  func.func @transform_4(%arg0: i32, %arg1: i32) -> (i32, i32) {
    %c0_i32 = arith.constant 0 : i32
    %c0_i32_0 = arith.constant 0 : i32
    %c0_i32_1 = arith.constant 0 : i32
    return %c0_i32, %c0_i32_0 : i32, i32
  }
  func.func @transform_5(%arg0: i32, %arg1: i32) -> (i32, i32) {
    %c0_i32 = arith.constant 0 : i32
    %c0_i32_0 = arith.constant 0 : i32
    %c0_i32_1 = arith.constant 0 : i32
    return %c0_i32, %c0_i32_0 : i32, i32
  }
  func.func @transform_6(%arg0: i32, %arg1: i32) -> (i32, i32) {
    %c0_i32 = arith.constant 0 : i32
    %c0_i32_0 = arith.constant 0 : i32
    return %arg0, %c0_i32 : i32, i32
  }
  func.func @transform_7(%arg0: i32, %arg1: i32) -> (i32, i32) {
    %c0_i32 = arith.constant 0 : i32
    %c0_i32_0 = arith.constant 0 : i32
    return %arg0, %c0_i32 : i32, i32
  }
}

</mosaic_0001>

<bundles_post_ra>
// kernel: tpu_custom_call.1
= control target key start
LH: loop header
LB: loop body
LE: loop exit
PB: predicated region body
PF: predicated region fallthrough
CT: control target
= control target key end

     0   :  { %13 = vsyncpa [#allocation6], 0  ;;  %s1393_s0 = inlined_call_operand.hbm [shape: bf16[16,128], index: 0, kind: input, shape index: {}]   ;;  %s1394_s1 = inlined_call_operand.hbm [shape: f32[16,128], index: 1, kind: input, shape index: {}]   ;;  %s1395_s2 = inlined_call_operand.hbm [shape: f32[16,128], index: 2, kind: input, shape index: {}]   ;;  %s1396_s3 = inlined_call_operand.hbm [shape: bf16[128,512], index: 3, kind: input, shape index: {}]   ;;  %s1397_s4 = inlined_call_operand.hbm [shape: bf16[128,512], index: 4, kind: input, shape index: {}]   ;;  %s1398_s5 = inlined_call_operand.vmem [shape: f32[1,512], index: 5, kind: input, shape index: {}]   ;;  %s1399_s6 = inlined_call_operand.hbm [shape: f32[16,128], index: 6, kind: output, shape index: {0}]   ;;  %s1400_s7 = inlined_call_operand.hbm [shape: f32[16,128], index: 7, kind: output, shape index: {1}]  }
   0x1   :  { %14 = vsyncpa [#allocation9], 0 }
   0x2   :  { %15 = vsyncpa [#allocation12], 0 }
   0x3   :  { %16 = vsyncpa [#allocation7], 0  ;;  %s39_s26 = sshll.u32 %s1394_s1, 4  ;;  %s40_s26 = int_to_ptr.hbm [resolvable:$true] %s39_s26 }
   0x4   :  { %17 = vsyncpa [#allocation16], 0  ;;  %s1304_s27 = smov [#allocation8]   ;;  %s65_s8 = sshll.u32 %s1396_s3, 4  ;;  %s66_s8 = int_to_ptr.hbm [resolvable:$true] %s65_s8 }
   0x5   :  { %s41_s28 = sshll.u32 %s1304_s27, 4  ;;  %s1305_s9 = smov 128   ;;  %s42_s28 = int_to_ptr.vmem [resolvable:$true] %s41_s28 }
   0x6   :  { %s1306_s10 = smov 8   ;;  %s1307_s11 = smov [#allocation11]  }
   0x7   :  { %47 = dma.hbm_to_vmem [thread:$0]  %s40_s26, 256, %s42_s28, [#allocation9], %s1305_s9, %s1305_s9, %s1306_s10  }
   0x8   :  { %s67_s12 = sshll.u32 %s1307_s11, 4  ;;  %s1308_s1 = smov 256   ;;  %s68_s12 = int_to_ptr.vmem [resolvable:$true] %s67_s12 }
   0x9   :  { %s1309_s13 = smov 16   ;;  %s26_s16 = sshll.u32 %s1393_s0, 4  ;;  %s27_s16 = int_to_ptr.hbm [resolvable:$true] %s26_s16 }
   0xa   :  { %73 = dma.hbm_to_vmem [thread:$0]  %s66_s8, 4096, %s68_s12, [#allocation12], %s1308_s1, %s1308_s1, %s1309_s13  }
   0xb   :  { %s1310_s17 = smov [#allocation5]   ;;  %s52_s20 = sshll.u32 %s1395_s2, 4  ;;  %s53_s20 = int_to_ptr.hbm [resolvable:$true] %s52_s20 }
   0xc   :  { %s28_s3 = sshll.u32 %s1310_s17, 4  ;;  %s1311_s21 = smov 64   ;;  %s29_s3 = int_to_ptr.vmem [resolvable:$true] %s28_s3 }
   0xd   :  { %s1312_s22 = smov 4   ;;  %s1313_s23 = smov [#allocation10]  }
   0xe   :  { %34 = dma.hbm_to_vmem [thread:$0]  %s27_s16, 128, %s29_s3, [#allocation6], %s1311_s21, %s1311_s21, %s1312_s22  }
   0xf   :  { %s54_s24 = sshll.u32 %s1313_s23, 4  ;;  %s78_s27 = sshll.u32 %s1397_s4, 4  ;;  %s55_s24 = int_to_ptr.vmem [resolvable:$true] %s54_s24  ;;  %s79_s27 = int_to_ptr.hbm [resolvable:$true] %s78_s27 }
  0x10   :  { %60 = dma.hbm_to_vmem [thread:$0]  %s53_s20, 256, %s55_s24, [#allocation9], %s1305_s9, %s1305_s9, %s1306_s10  }
  0x11   :  { %s1314_s0 = smov [#allocation13]  }
  0x12   :  { %s80_s28 = sshll.u32 %s1314_s0, 4  ;;  %s81_s28 = int_to_ptr.vmem [resolvable:$true] %s80_s28 }
  0x13   :  { %86 = dma.hbm_to_vmem [thread:$0]  %s79_s27, 4096, %s81_s28, [#allocation12], %s1308_s1, %s1308_s1, %s1309_s13  }
  0x14   :  { %1294 = dma.done.wait [#allocation6], 128  }
  0x15   :  { %1295 = vsyncadd [#allocation6], 4294967168 }
  0x16   :  { %1296 = dma.done.wait [#allocation9], 512  }
  0x17   :  { %1297 = vsyncadd [#allocation9], 4294966784 }
  0x18   :  { %1298 = dma.done.wait [#allocation12], 8192  }
  0x19   :  { %1299 = vsyncadd [#allocation12], 4294959104  ;;  %v871_v0 = vld [vmem:[#allocation11 + $0xe0] sm:$0xf]  ;;  %v1048_v1 = vld [vmem:[#allocation11 + $0xec] sm:$0xf0] }
  0x1a   :  { %v1046_v2 = vld [vmem:[#allocation11 + $0xe4] sm:$0xf]  ;;  %v872_v3 = vor.u32 %v1048_v1, %v871_v0  ;;  %v873_v4 = vld [vmem:[#allocation11 + $0xf0] sm:$0xf0]  ;;  %v879_v5 = vld [vmem:[#allocation11 + $0xe8] sm:$0xf] }
  0x1b   :  { %v1049_v6 = vld [vmem:[#allocation11 + $0xf4] sm:$0xf0]  ;;  %v876_v7 = vor.u32 %v1046_v2, %v873_v4  ;;  %v1047_v9 = vld [vmem:[#allocation11 + $0xec] sm:$0xf]  ;;  %v881_v10 = vld [vmem:[#allocation11 + $0xf8] sm:$0xf0] }
  0x1c   :  { %v880_v8 = vor.u32 %v1049_v6, %v879_v5  ;;  %v855_v11 = vld [vmem:[#allocation11 + $0xc0] sm:$0xf]  ;;  %337 = vmatpush.bf16.msra.mxu0 %v872_v3  ;;  %v884_v12 = vor.u32 %v1047_v9, %v881_v10  ;;  %v1044_v13 = vld [vmem:[#allocation11 + $0xcc] sm:$0xf0]  ;;  %v1042_v14 = vld [vmem:[#allocation11 + $0xc4] sm:$0xf] }
  0x1d   :  { %v857_v15 = vld [vmem:[#allocation11 + $0xd0] sm:$0xf0]  ;;  %351 = vmatpush.bf16.msra.mxu1 %v876_v7  ;;  %v856_v16 = vor.u32 %v1044_v13, %v855_v11  ;;  %v863_v18 = vld [vmem:[#allocation11 + $0xc8] sm:$0xf]  ;;  %v1045_v19 = vld [vmem:[#allocation11 + $0xd4] sm:$0xf0] }
  0x1e   :  { %365 = vmatpush.bf16.msra.mxu2 %v880_v8  ;;  %v860_v17 = vor.u32 %v1042_v14, %v857_v15  ;;  %v1043_v20 = vld [vmem:[#allocation11 + $0xcc] sm:$0xf]  ;;  %379 = vmatpush.bf16.msra.mxu3 %v884_v12  ;;  %v864_v21 = vor.u32 %v1045_v19, %v863_v18  ;;  %v865_v22 = vld [vmem:[#allocation11 + $0xd8] sm:$0xf0]  ;;  %v839_v23 = vld [vmem:[#allocation11 + $0xa0] sm:$0xf] }
  0x1f   :  { %v1040_v24 = vld [vmem:[#allocation11 + $0xac] sm:$0xf0]  ;;  %v868_v25 = vor.u32 %v1043_v20, %v865_v22  ;;  %v1038_v26 = vld [vmem:[#allocation11 + $0xa4] sm:$0xf]  ;;  %v841_v27 = vld [vmem:[#allocation11 + $0xb0] sm:$0xf0] }
  0x20   :  { %v847_v28 = vld [vmem:[#allocation11 + $0xa8] sm:$0xf]  ;;  %338 = vmatpush.bf16.msra.mxu0 %v856_v16  ;;  %v840_v29 = vor.u32 %v1040_v24, %v839_v23  ;;  %v1041_v30 = vld [vmem:[#allocation11 + $0xb4] sm:$0xf0]  ;;  %v1039_v31 = vld [vmem:[#allocation11 + $0xac] sm:$0xf]  ;;  %v844_v33 = vor.u32 %v1038_v26, %v841_v27 }
  0x21   :  { %v849_v32 = vld [vmem:[#allocation11 + $0xb8] sm:$0xf0]  ;;  %352 = vmatpush.bf16.msra.mxu1 %v860_v17  ;;  %v848_v34 = vor.u32 %v1041_v30, %v847_v28  ;;  %v823_v35 = vld [vmem:[#allocation11 + $0x80] sm:$0xf]  ;;  %v1036_v36 = vld [vmem:[#allocation11 + $0x8c] sm:$0xf0] }
  0x22   :  { %366 = vmatpush.bf16.msra.mxu2 %v864_v21  ;;  %v1034_v37 = vld [vmem:[#allocation11 + $0x84] sm:$0xf]  ;;  %380 = vmatpush.bf16.msra.mxu3 %v868_v25  ;;  %v852_v38 = vor.u32 %v1039_v31, %v849_v32  ;;  %v825_v39 = vld [vmem:[#allocation11 + $0x90] sm:$0xf0]  ;;  %v831_v40 = vld [vmem:[#allocation11 + $0x88] sm:$0xf]  ;;  %v824_v44 = vor.u32 %v1036_v36, %v823_v35 }
  0x23   :  { %v1037_v41 = vld [vmem:[#allocation11 + $0x94] sm:$0xf0]  ;;  %v1035_v42 = vld [vmem:[#allocation11 + $0x8c] sm:$0xf]  ;;  %v833_v43 = vld [vmem:[#allocation11 + $0x98] sm:$0xf0]  ;;  %v828_v45 = vor.u32 %v1034_v37, %v825_v39 }
  0x24   :  { %339 = vmatpush.bf16.msra.mxu0 %v840_v29  ;;  %v832_v46 = vor.u32 %v1037_v41, %v831_v40  ;;  %v807_v47 = vld [vmem:[#allocation11 + $0x60] sm:$0xf]  ;;  %v1032_v48 = vld [vmem:[#allocation11 + $0x6c] sm:$0xf0]  ;;  %v1030_v49 = vld [vmem:[#allocation11 + $0x64] sm:$0xf]  ;;  %v836_v50 = vor.u32 %v1035_v42, %v833_v43 }
  0x25   :  { %353 = vmatpush.bf16.msra.mxu1 %v844_v33  ;;  %v809_v51 = vld [vmem:[#allocation11 + $0x70] sm:$0xf0]  ;;  %v815_v52 = vld [vmem:[#allocation11 + $0x68] sm:$0xf]  ;;  %v1033_v53 = vld [vmem:[#allocation11 + $0x74] sm:$0xf0]  ;;  %v808_v56 = vor.u32 %v1032_v48, %v807_v47 }
  0x26   :  { %367 = vmatpush.bf16.msra.mxu2 %v848_v34  ;;  %381 = vmatpush.bf16.msra.mxu3 %v852_v38  ;;  %v1031_v54 = vld [vmem:[#allocation11 + $0x6c] sm:$0xf]  ;;  %v817_v55 = vld [vmem:[#allocation11 + $0x78] sm:$0xf0]  ;;  %v812_v57 = vor.u32 %v1030_v49, %v809_v51  ;;  %v816_v58 = vor.u32 %v1033_v53, %v815_v52  ;;  %v791_v59 = vld [vmem:[#allocation11 + $0x40] sm:$0xf] }
  0x27   :  { %v1028_v60 = vld [vmem:[#allocation11 + $0x4c] sm:$0xf0]  ;;  %v1026_v61 = vld [vmem:[#allocation11 + $0x44] sm:$0xf]  ;;  %v820_v62 = vor.u32 %v1031_v54, %v817_v55  ;;  %v793_v63 = vld [vmem:[#allocation11 + $0x50] sm:$0xf0] }
  0x28   :  { %340 = vmatpush.bf16.msra.mxu0 %v824_v44  ;;  %v799_v0 = vld [vmem:[#allocation11 + $0x48] sm:$0xf]  ;;  %v1029_v1 = vld [vmem:[#allocation11 + $0x54] sm:$0xf0]  ;;  %v1027_v2 = vld [vmem:[#allocation11 + $0x4c] sm:$0xf]  ;;  %v792_v4 = vor.u32 %v1028_v60, %v791_v59  ;;  %v796_v5 = vor.u32 %v1026_v61, %v793_v63 }
  0x29   :  { %354 = vmatpush.bf16.msra.mxu1 %v828_v45  ;;  %v801_v3 = vld [vmem:[#allocation11 + $0x58] sm:$0xf0]  ;;  %v800_v6 = vor.u32 %v1029_v1, %v799_v0  ;;  %v775_v7 = vld [vmem:[#allocation11 + $0x20] sm:$0xf]  ;;  %v1024_v8 = vld [vmem:[#allocation11 + $0x2c] sm:$0xf0] }
  0x2a   :  { %368 = vmatpush.bf16.msra.mxu2 %v832_v46  ;;  %382 = vmatpush.bf16.msra.mxu3 %v836_v50  ;;  %v1022_v9 = vld [vmem:[#allocation11 + $0x24] sm:$0xf]  ;;  %v804_v10 = vor.u32 %v1027_v2, %v801_v3  ;;  %v777_v11 = vld [vmem:[#allocation11 + $0x30] sm:$0xf0]  ;;  %v783_v12 = vld [vmem:[#allocation11 + $0x28] sm:$0xf]  ;;  %v776_v16 = vor.u32 %v1024_v8, %v775_v7 }
  0x2b   :  { %v1025_v13 = vld [vmem:[#allocation11 + $0x34] sm:$0xf0]  ;;  %v1023_v14 = vld [vmem:[#allocation11 + $0x2c] sm:$0xf]  ;;  %v785_v15 = vld [vmem:[#allocation11 + $0x38] sm:$0xf0]  ;;  %v780_v19 = vor.u32 %v1022_v9, %v777_v11 }
  0x2c   :  { %341 = vmatpush.bf16.msra.mxu0 %v808_v56  ;;  %v759_v17 = vld [vmem:[#allocation11] sm:$0xf]  ;;  %v1020_v18 = vld [vmem:[#allocation11 + $0xc] sm:$0xf0]  ;;  %v784_v20 = vor.u32 %v1025_v13, %v783_v12  ;;  %v1018_v21 = vld [vmem:[#allocation11 + $0x4] sm:$0xf]  ;;  %v788_v24 = vor.u32 %v1023_v14, %v785_v15 }
  0x2d   :  { %355 = vmatpush.bf16.msra.mxu1 %v812_v57  ;;  %v761_v22 = vld [vmem:[#allocation11 + $0x10] sm:$0xf0]  ;;  %v767_v23 = vld [vmem:[#allocation11 + $0x8] sm:$0xf]  ;;  %v1021_v25 = vld [vmem:[#allocation11 + $0x14] sm:$0xf0]  ;;  %v760_v31 = vor.u32 %v1020_v18, %v759_v17 }
  0x2e   :  { %369 = vmatpush.bf16.msra.mxu2 %v816_v58  ;;  %383 = vmatpush.bf16.msra.mxu3 %v820_v62  ;;  %v1019_v26 = vld [vmem:[#allocation11 + $0xc] sm:$0xf]  ;;  %v769_v27 = vld [vmem:[#allocation11 + $0x18] sm:$0xf0]  ;;  %v1003_v28 = vld [vmem:[#allocation13 + $0xe0] sm:$0xf]  ;;  %v764_v35 = vor.u32 %v1018_v21, %v761_v22  ;;  %v768_v36 = vor.u32 %v1021_v25, %v767_v23 }
  0x2f   :  { %v1081_v29 = vld [vmem:[#allocation13 + $0xec] sm:$0xf0]  ;;  %v1079_v30 = vld [vmem:[#allocation13 + $0xe4] sm:$0xf]  ;;  %v1005_v32 = vld [vmem:[#allocation13 + $0xf0] sm:$0xf0]  ;;  %v772_v39 = vor.u32 %v1019_v26, %v769_v27 }
  0x30   :  { %342 = vmatpush.bf16.msra.mxu0 %v792_v4  ;;  %v1011_v33 = vld [vmem:[#allocation13 + $0xe8] sm:$0xf]  ;;  %v1082_v34 = vld [vmem:[#allocation13 + $0xf4] sm:$0xf0]  ;;  %v1080_v37 = vld [vmem:[#allocation13 + $0xec] sm:$0xf]  ;;  %v1004_v40 = vor.u32 %v1081_v29, %v1003_v28  ;;  %v1008_v42 = vor.u32 %v1079_v30, %v1005_v32 }
  0x31   :  { %356 = vmatpush.bf16.msra.mxu1 %v796_v5  ;;  %v1013_v38 = vld [vmem:[#allocation13 + $0xf8] sm:$0xf0]  ;;  %v987_v41 = vld [vmem:[#allocation13 + $0xc0] sm:$0xf]  ;;  %v1012_v43 = vor.u32 %v1082_v34, %v1011_v33  ;;  %v1077_v44 = vld [vmem:[#allocation13 + $0xcc] sm:$0xf0] }
  0x32   :  { %370 = vmatpush.bf16.msra.mxu2 %v800_v6  ;;  %384 = vmatpush.bf16.msra.mxu3 %v804_v10  ;;  %v1075_v45 = vld [vmem:[#allocation13 + $0xc4] sm:$0xf]  ;;  %v989_v46 = vld [vmem:[#allocation13 + $0xd0] sm:$0xf0]  ;;  %v1016_v47 = vor.u32 %v1080_v37, %v1013_v38  ;;  %v995_v48 = vld [vmem:[#allocation13 + $0xc8] sm:$0xf]  ;;  %v988_v53 = vor.u32 %v1077_v44, %v987_v41 }
  0x33   :  { %v1078_v49 = vld [vmem:[#allocation13 + $0xd4] sm:$0xf0]  ;;  %v1076_v51 = vld [vmem:[#allocation13 + $0xcc] sm:$0xf]  ;;  %v997_v52 = vld [vmem:[#allocation13 + $0xd8] sm:$0xf0]  ;;  %v992_v54 = vor.u32 %v1075_v45, %v989_v46 }
  0x34   :  { %343 = vmatpush.bf16.msra.mxu0 %v776_v16  ;;  %v1017_v50 = vld [vmem:[#allocation5] sm:$0xff]  ;;  %v996_v55 = vor.u32 %v1078_v49, %v995_v48  ;;  %v971_v56 = vld [vmem:[#allocation13 + $0xa0] sm:$0xf]  ;;  %v1073_v57 = vld [vmem:[#allocation13 + $0xac] sm:$0xf0]  ;;  %v1000_v59 = vor.u32 %v1076_v51, %v997_v52  ;;  %s733_s11 = sshll.u32 %s1400_s7, 4  ;;  %s734_s11 = int_to_ptr.hbm [resolvable:$true] %s733_s11 }
  0x35   :  { %357 = vmatpush.bf16.msra.mxu1 %v780_v19  ;;  %v1071_v58 = vld [vmem:[#allocation13 + $0xa4] sm:$0xf]  ;;  %v973_v60 = vld [vmem:[#allocation13 + $0xb0] sm:$0xf0]  ;;  %v979_v61 = vld [vmem:[#allocation13 + $0xa8] sm:$0xf]  ;;  %v972_v1 = vor.u32 %v1073_v57, %v971_v56 }
  0x36   :  { %371 = vmatpush.bf16.msra.mxu2 %v784_v20  ;;  %385 = vmatpush.bf16.msra.mxu3 %v788_v24  ;;  %v1074_v62 = vld [vmem:[#allocation13 + $0xb4] sm:$0xf0]  ;;  %v1072_v63 = vld [vmem:[#allocation13 + $0xac] sm:$0xf]  ;;  %v981_v0 = vld [vmem:[#allocation13 + $0xb8] sm:$0xf0]  ;;  %v976_v2 = vor.u32 %v1071_v58, %v973_v60 }
  0x37   :  { %v980_v3 = vor.u32 %v1074_v62, %v979_v61  ;;  %v955_v4 = vld [vmem:[#allocation13 + $0x80] sm:$0xf]  ;;  %v1069_v5 = vld [vmem:[#allocation13 + $0x8c] sm:$0xf0]  ;;  %v1067_v6 = vld [vmem:[#allocation13 + $0x84] sm:$0xf]  ;;  %v984_v7 = vor.u32 %v1072_v63, %v981_v0 }
  0x38   :  { %344 = vmatpush.bf16.msra.mxu0 %v760_v31  ;;  %v957_v8 = vld [vmem:[#allocation13 + $0x90] sm:$0xf0]  ;;  %v963_v9 = vld [vmem:[#allocation13 + $0x88] sm:$0xf]  ;;  %v1070_v10 = vld [vmem:[#allocation13 + $0x94] sm:$0xf0]  ;;  %v956_v13 = vor.u32 %v1069_v5, %v955_v4 }
  0x39   :  { %358 = vmatpush.bf16.msra.mxu1 %v764_v35  ;;  %v1068_v11 = vld [vmem:[#allocation13 + $0x8c] sm:$0xf]  ;;  %v965_v12 = vld [vmem:[#allocation13 + $0x98] sm:$0xf0]  ;;  %v939_v14 = vld [vmem:[#allocation13 + $0x60] sm:$0xf]  ;;  %v960_v16 = vor.u32 %v1067_v6, %v957_v8  ;;  %v964_v17 = vor.u32 %v1070_v10, %v963_v9 }
  0x3a   :  { %372 = vmatpush.bf16.msra.mxu2 %v768_v36  ;;  %386 = vmatpush.bf16.msra.mxu3 %v772_v39  ;;  %v1065_v15 = vld [vmem:[#allocation13 + $0x6c] sm:$0xf0]  ;;  %v1063_v18 = vld [vmem:[#allocation13 + $0x64] sm:$0xf]  ;;  %v941_v19 = vld [vmem:[#allocation13 + $0x70] sm:$0xf0]  ;;  %v968_v21 = vor.u32 %v1068_v11, %v965_v12 }
  0x3b   :  { %345 = vmatmul.bf16.vlgmr.msra.gmra.mxu0 %v1017_v50  ;;  %v947_v20 = vld [vmem:[#allocation13 + $0x68] sm:$0xf]  ;;  %v1066_v22 = vld [vmem:[#allocation13 + $0x74] sm:$0xf0]  ;;  %v115_v23 = vld [vmem:[#allocation8] sm:$0xff]  ;;  %v940_v28 = vor.u32 %v1065_v15, %v939_v14  ;;  %v944_v30 = vor.u32 %v1063_v18, %v941_v19  ;;  %s1316_s12 = smov [#allocation14]  }
  0x3c   :  { %595 = vmatpush.bf16.msrb.mxu0 %v1004_v40  ;;  %359 = vmatmul.bf16.vlgmr.msra.gmra.mxu1 %v1017_v50  ;;  %v116_v24 = vld [vmem:[#allocation8 + $0x8] sm:$0xff]  ;;  %v949_v26 = vld [vmem:[#allocation13 + $0x78] sm:$0xf0]  ;;  %v923_v29 = vld [vmem:[#allocation13 + $0x40] sm:$0xf]  ;;  %v948_v31 = vor.u32 %v1066_v22, %v947_v20  ;;  %s718_s1 = sshll.u32 %s1316_s12, 4  ;;  %s719_s1 = int_to_ptr.vmem [resolvable:$true] %s718_s1 }
  0x3d   :  { %609 = vmatpush.bf16.msrb.mxu1 %v1008_v42  ;;  %387 = vmatmul.bf16.vlgmr.msra.gmra.mxu3 %v1017_v50  ;;  %v1064_v25 = vld [vmem:[#allocation13 + $0x6c] sm:$0xf]  ;;  %v1086_v27 = vpack.c.bf16 %v116_v24, %v115_v23  ;;  %v1061_v32 = vld [vmem:[#allocation13 + $0x4c] sm:$0xf0]  ;;  %v1059_v33 = vld [vmem:[#allocation13 + $0x44] sm:$0xf] }
  0x3e   :  { %623 = vmatpush.bf16.msrb.mxu2 %v1012_v43  ;;  %637 = vmatpush.bf16.msrb.mxu3 %v1016_v47  ;;  %v952_v34 = vor.u32 %v1064_v25, %v949_v26  ;;  %v925_v35 = vld [vmem:[#allocation13 + $0x50] sm:$0xf0]  ;;  %v931_v36 = vld [vmem:[#allocation13 + $0x48] sm:$0xf]  ;;  %v1062_v37 = vld [vmem:[#allocation13 + $0x54] sm:$0xf0]  ;;  %v924_v40 = vor.u32 %v1061_v32, %v923_v29 }
  0x3f   :  { %373 = vmatmul.bf16.vlgmr.msra.gmra.mxu2 %v1017_v50  ;;  %1087 = vst [vmem:[#allocation3] sm:$0xff] %v1086_v27   ;;  %v1060_v38 = vld [vmem:[#allocation13 + $0x4c] sm:$0xf]  ;;  %v933_v39 = vld [vmem:[#allocation13 + $0x58] sm:$0xf0]  ;;  %v928_v41 = vor.u32 %v1059_v33, %v925_v35  ;;  %v932_v42 = vor.u32 %v1062_v37, %v931_v36  ;;  %s720_s14 = sshll.u32 %s1399_s6, 4  ;;  %s721_s14 = int_to_ptr.hbm [resolvable:$true] %s720_s14 }
  0x40   :  { %596 = vmatpush.bf16.msrb.mxu0 %v988_v53  ;;  %v907_v43 = vld [vmem:[#allocation13 + $0x20] sm:$0xf]  ;;  %v1057_v44 = vld [vmem:[#allocation13 + $0x2c] sm:$0xf0]  ;;  %v1055_v45 = vld [vmem:[#allocation13 + $0x24] sm:$0xf]  ;;  %v936_v46 = vor.u32 %v1060_v38, %v933_v39 }
  0x41   :  { %610 = vmatpush.bf16.msrb.mxu1 %v992_v54  ;;  %v909_v47 = vld [vmem:[#allocation13 + $0x30] sm:$0xf0]  ;;  %v915_v48 = vld [vmem:[#allocation13 + $0x28] sm:$0xf]  ;;  %v1058_v49 = vld [vmem:[#allocation13 + $0x34] sm:$0xf0]  ;;  %v908_v52 = vor.u32 %v1057_v44, %v907_v43 }
  0x42   :  { %624 = vmatpush.bf16.msrb.mxu2 %v996_v55  ;;  %638 = vmatpush.bf16.msrb.mxu3 %v1000_v59  ;;  %v1056_v50 = vld [vmem:[#allocation13 + $0x2c] sm:$0xf]  ;;  %v917_v51 = vld [vmem:[#allocation13 + $0x38] sm:$0xf0]  ;;  %v912_v53 = vor.u32 %v1055_v45, %v909_v47  ;;  %v916_v54 = vor.u32 %v1058_v49, %v915_v48  ;;  %v891_v55 = vld [vmem:[#allocation13] sm:$0xf] }
  0x43   :  { %v1053_v56 = vld [vmem:[#allocation13 + $0xc] sm:$0xf0]  ;;  %v1051_v57 = vld [vmem:[#allocation13 + $0x4] sm:$0xf]  ;;  %v920_v58 = vor.u32 %v1056_v50, %v917_v51  ;;  %v893_v59 = vld [vmem:[#allocation13 + $0x10] sm:$0xf0] }
  0x44   :  { %597 = vmatpush.bf16.msrb.mxu0 %v972_v1  ;;  %v899_v60 = vld [vmem:[#allocation13 + $0x8] sm:$0xf]  ;;  %v1054_v61 = vld [vmem:[#allocation13 + $0x14] sm:$0xf0]  ;;  %v1052_v62 = vld [vmem:[#allocation13 + $0xc] sm:$0xf]  ;;  %v892_v0 = vor.u32 %v1053_v56, %v891_v55  ;;  %v896_v1 = vor.u32 %v1051_v57, %v893_v59 }
  0x45   :  { %611 = vmatpush.bf16.msrb.mxu1 %v976_v2  ;;  %v901_v63 = vld [vmem:[#allocation13 + $0x18] sm:$0xf0]  ;;  %v900_v2 = vor.u32 %v1054_v61, %v899_v60  ;;  %v161_v9 = vld [vmem:[%s1398_s5] sm:$0xf]  ;;  %s1315_s5 = smov [#allocation15]  }
  0x46   :  { %625 = vmatpush.bf16.msrb.mxu2 %v980_v3  ;;  %639 = vmatpush.bf16.msrb.mxu3 %v984_v7  ;;  %v904_v3 = vor.u32 %v1052_v62, %v901_v63  ;;  %v1050_v4 = vld [vmem:[#allocation3] sm:$0xff]  ;;  %v163_v12 = vperm.slane %v161_v9, 0  ;;  %v166_v23 = vperm.slane %v161_v9, 3  ;;  %v124_v63 = vld [vmem:[#allocation10 + $0x8] sm:$0xff]  ;;  %s731_s29 = sshll.u32 %s1315_s5, 4  ;;  %s732_s29 = int_to_ptr.vmem [resolvable:$true] %s731_s29 }
  0x47   :  { %v123_v44 = vld [vmem:[#allocation10] sm:$0xff] }
  0x48   :  { %598 = vmatpush.bf16.msrb.mxu0 %v956_v13  ;;  %v164_v13 = vperm.slane %v161_v9, 1 }
  0x49   :  { %612 = vmatpush.bf16.msrb.mxu1 %v960_v16 }
  0x4a   :  { %626 = vmatpush.bf16.msrb.mxu2 %v964_v17  ;;  %640 = vmatpush.bf16.msrb.mxu3 %v968_v21  ;;  %v165_v21 = vperm.slane %v161_v9, 2 }
  0x4c   :  { %599 = vmatpush.bf16.msrb.mxu0 %v940_v28 }
  0x4d   :  { %613 = vmatpush.bf16.msrb.mxu1 %v944_v30 }
  0x4e   :  { %627 = vmatpush.bf16.msrb.mxu2 %v948_v31  ;;  %641 = vmatpush.bf16.msrb.mxu3 %v952_v34 }
  0x50   :  { %600 = vmatpush.bf16.msrb.mxu0 %v924_v40 }
  0x51   :  { %614 = vmatpush.bf16.msrb.mxu1 %v928_v41 }
  0x52   :  { %628 = vmatpush.bf16.msrb.mxu2 %v932_v42  ;;  %642 = vmatpush.bf16.msrb.mxu3 %v936_v46 }
  0x54   :  { %601 = vmatpush.bf16.msrb.mxu0 %v908_v52 }
  0x55   :  { %615 = vmatpush.bf16.msrb.mxu1 %v912_v53 }
  0x56   :  { %629 = vmatpush.bf16.msrb.mxu2 %v916_v54  ;;  %643 = vmatpush.bf16.msrb.mxu3 %v920_v58 }
  0x58   :  { %602 = vmatpush.bf16.msrb.mxu0 %v892_v0 }
  0x59   :  { %616 = vmatpush.bf16.msrb.mxu1 %v896_v1 }
  0x5a   :  { %630 = vmatpush.bf16.msrb.mxu2 %v900_v2  ;;  %644 = vmatpush.bf16.msrb.mxu3 %v904_v3 }
  0x5b   :  { %603 = vmatmul.bf16.vlgmr.msrb.gmra.mxu0 %v1050_v4 }
  0x5c   :  { %617 = vmatmul.bf16.vlgmr.msrb.gmra.mxu1 %v1050_v4 }
  0x5d   :  { %631 = vmatmul.bf16.vlgmr.msrb.gmra.mxu2 %v1050_v4  ;;  %645 = vmatmul.bf16.vlgmr.msrb.gmra.mxu3 %v1050_v4 }
  0xb8   :  { %v346_v5 = vpop.f32.mrf.mxu0 }
  0xb9   :  { %v360_v6 = vpop.f32.mrf.mxu1  ;;  %v347_v14 = vadd.f32 %v346_v5, %v163_v12 }
  0xba   :  { %v361_v16 = vadd.f32 %v360_v6, %v164_v13 }
  0xc0   :  { %v388_v8 = vpop.f32.mrf.mxu3  ;;  %v348_v10 = vpop.f32.mrf.mxu0 }
  0xc1   :  { %v362_v11 = vpop.f32.mrf.mxu1  ;;  %v389_v27 = vadd.f32 %v388_v8, %v166_v23  ;;  %v349_v28 = vadd.f32 %v348_v10, %v163_v12 }
  0xc2   :  { %v374_v7 = vpop.f32.mrf.mxu2  ;;  %v363_v30 = vadd.f32 %v362_v11, %v164_v13 }
  0xc3   :  { %v375_v26 = vadd.f32 %v374_v7, %v165_v21 }
  0xc8   :  { %v390_v17 = vpop.f32.mrf.mxu3 }
  0xc9   :  { %v391_v48 = vadd.f32 %v390_v17, %v166_v23 }
  0xca   :  { %v376_v15 = vpop.f32.mrf.mxu2 }
  0xcb   :  { %v377_v46 = vadd.f32 %v376_v15, %v165_v21 }
  0xd8   :  { %v604_v18 = vpop.f32.mrf.mxu0 }
  0xd9   :  { %v651_v19 = vadd.f32 %v604_v18, %v347_v14  ;;  %v618_v20 = vpop.f32.mrf.mxu1 }
  0xda   :  { %v652_v22 = vadd.f32 %v618_v20, %v361_v16 }
  0xdb   :  { %v659_v24 = vmul.f32 0.5, %v651_v19 }
  0xdc   :  { %v667_v25 = vmul.f32 0.5, %v652_v22 }
  0xdd   :  { %1106 = vtanh.f32 %v659_v24 }
  0xde   :  { %1108 = vtanh.f32 %v667_v25 }
  0xe0   :  { %v632_v29 = vpop.f32.mrf.mxu2  ;;  %v646_v32 = vpop.f32.mrf.mxu3 }
  0xe1   :  { %v653_v31 = vadd.f32 %v632_v29, %v375_v26  ;;  %v606_v33 = vpop.f32.mrf.mxu0  ;;  %v654_v34 = vadd.f32 %v646_v32, %v389_v27  ;;  %v620_v36 = vpop.f32.mrf.mxu1 }
  0xe2   :  { %v655_v35 = vadd.f32 %v606_v33, %v349_v28  ;;  %v656_v38 = vadd.f32 %v620_v36, %v363_v30 }
  0xe3   :  { %v675_v37 = vmul.f32 0.5, %v653_v31  ;;  %v1107_v39 = vpop.eup %1106  ;;  %1110 = vtanh.f32 %v654_v34 }
  0xe4   :  { %v660_v40 = vmul.f32 0.5, %v655_v35  ;;  %v1109_v41 = vpop.eup %1108  ;;  %v663_v42 = vmul.f32 0.5, %v1107_v39  ;;  %v668_v43 = vmul.f32 0.5, %v656_v38 }
  0xe5   :  { %1112 = vtanh.f32 %v675_v37  ;;  %v671_v45 = vmul.f32 0.5, %v1109_v41 }
  0xe6   :  { %1114 = vtanh.f32 %v660_v40  ;;  %v665_v47 = vadd.f32 0.5, %v663_v42 }
  0xe7   :  { %1116 = vtanh.f32 %v668_v43  ;;  %v673_v49 = vadd.f32 0.5, %v671_v45 }
  0xe8   :  { %v634_v50 = vpop.f32.mrf.mxu2  ;;  %v685_v51 = vmul.f32 %v665_v47, %v123_v44  ;;  %v648_v53 = vpop.f32.mrf.mxu3 }
  0xe9   :  { %v657_v52 = vadd.f32 %v634_v50, %v377_v46  ;;  %v1111_v54 = vpop.eup %1110  ;;  %v658_v55 = vadd.f32 %v648_v53, %v391_v48 }
  0xea   :  { %v687_v57 = vmul.f32 %v1111_v54, %v673_v49 }
  0xeb   :  { %v1113_v56 = vpop.eup %1112  ;;  %v676_v58 = vmul.f32 0.5, %v657_v52  ;;  %1118 = vtanh.f32 %v658_v55 }
  0xec   :  { %v1115_v59 = vpop.eup %1114  ;;  %v689_v61 = vadd.f32 %v687_v57, %v685_v51  ;;  %v679_v2 = vmul.f32 0.5, %v1113_v56 }
  0xed   :  { %v1117_v60 = vpop.eup %1116  ;;  %v664_v62 = vmul.f32 0.5, %v1115_v59  ;;  %1120 = vtanh.f32 %v676_v58 }
  0xee   :  { %v672_v0 = vmul.f32 0.5, %v1117_v60  ;;  %1122 = vtanh.f32 %v689_v61  ;;  %712 = vst [vmem:[#allocation15] sm:$0xff] %v689_v61  ;;  %v681_v8 = vadd.f32 0.5, %v679_v2 }
  0xef   :  { %v666_v1 = vadd.f32 0.5, %v664_v62 }
  0xf0   :  { %v674_v3 = vadd.f32 0.5, %v672_v0 }
  0xf1   :  { %v686_v4 = vmul.f32 %v666_v1, %v124_v63  ;;  %v1119_v5 = vpop.eup %1118 }
  0xf2   :  { %v688_v6 = vmul.f32 %v1119_v5, %v674_v3 }
  0xf3   :  { %v1121_v7 = vpop.eup %1120 }
  0xf4   :  { %v1123_v9 = vpop.eup %1122  ;;  %v690_v10 = vadd.f32 %v688_v6, %v686_v4  ;;  %v680_v12 = vmul.f32 0.5, %v1121_v7 }
  0xf5   :  { %v693_v11 = vmul.f32 %v1123_v9, %v681_v8 }
  0xf6   :  { %1124 = vtanh.f32 %v690_v10  ;;  %713 = vst [vmem:[#allocation15 + $0x8] sm:$0xff] %v690_v10  ;;  %v682_v13 = vadd.f32 0.5, %v680_v12 }
  0xf7   :  { %708 = vst [vmem:[#allocation14] sm:$0xff] %v693_v11  ;;  %739 = dma.vmem_to_hbm [thread:$0]  %s732_s29, 256, %s734_s11, [#allocation16], %s1305_s9, %s1305_s9, %s1306_s10  }
  0xfc   :  { %v1125_v14 = vpop.eup %1124 }
  0xfd   :  { %v694_v15 = vmul.f32 %v1125_v14, %v682_v13 }
  0xff   :  { %v1091_v16 = vpack.c.bf16 %v694_v15, %v693_v11  ;;  %709 = vst [vmem:[#allocation14 + $0x8] sm:$0xff] %v694_v15 }
 0x100   :  { %726 = dma.vmem_to_hbm [thread:$0]  %s719_s1, 256, %s721_s14, [#allocation7], %s1305_s9, %s1305_s9, %s1306_s10  }
 0x101   :  { %1092 = vst [vmem:[#allocation3] sm:$0xff] %v1091_v16  }
 0x102   :  { %1300 = dma.done.wait [#allocation7], 256  }
 0x103   :  { %1301 = vsyncadd [#allocation7], 4294967040 }
 0x104   :  { %1302 = dma.done.wait [#allocation16], 256  }
 0x105   :  { %1303 = vsyncadd [#allocation16], 4294967040 }
 0x106   :  { %748 = vsyncpa [#allocation6], 1 }
 0x107   :  { %749 = vsyncpa [#allocation9], 1 }
 0x108   :  { %750 = vsyncpa [#allocation12], 1 }
 0x109   :  { %751 = vsyncpa [#allocation7], 1 }
 0x10a   :  { %752 = vsyncpa [#allocation16], 1 }

</bundles_post_ra>
